<compile_context>
chip_gen: v7x
topology: tpu7x:2x2x1
jax: 0.10.0
libtpu: 0.0.40
codegen_flags: <defaults>
</compile_context>

<pallas_src>
import functools

import jax
import jax.numpy as jnp
from jax.experimental import pallas as pl
from jax.experimental.pallas import tpu as pltpu


# ----------------------------------------------------------------------------
# Small helpers.
# ----------------------------------------------------------------------------
def _sublane_multiple(dtype):
    """Sublane packing multiple: 8 rows for 32-bit, 16 for bf16, 32 for int8."""
    itemsize = jnp.dtype(dtype).itemsize
    return 8 * max(1, 4 // itemsize)


def _aligned_divisor(n, cap, mult):
    """Largest multiple of `mult` that divides n and is <= cap.

    Falls back to n itself (full extent is always a legal block)."""
    best = None
    lim = min(n, cap)
    d = mult
    while d <= lim:
        if n % d == 0:
            best = d
        d += mult
    return best if best is not None else n


def _vmem_capacity_bytes(override=None):
    if override is not None:
        return int(override)
    try:
        info = pltpu.get_tpu_info()
        cap = getattr(info, "vmem_capacity_bytes", None)
        if cap:
            return int(cap)
    except Exception:
        pass
    try:
        kind = jax.devices()[0].device_kind.lower()
        if "v7" in kind:
            return 64 * 1024 * 1024      # v7x: 64 MiB per TensorCore
    except Exception:
        pass
    return 128 * 1024 * 1024             # v5e / v6e physical VMEM


# Exact-erf GELU for use *inside* the kernel.  Mosaic's erf lowering is not
# guaranteed, so we use the Abramowitz & Stegun 7.1.26 rational approximation
# (max abs error ~1.5e-7 in erf -> negligible vs fp32 matmul noise); it only
# needs exp (EUP) and polynomial VPU ops.
# TODO(synk): switch to lax.erf if/when Mosaic guarantees a native lowering.
_ERF_P = 0.3275911
_ERF_A = (0.254829592, -0.284496736, 1.421413741, -1.453152027, 1.061405429)


def _erf_approx(x):
    s = jnp.where(x >= 0.0, 1.0, -1.0).astype(x.dtype)
    z = jnp.abs(x)
    t = 1.0 / (1.0 + _ERF_P * z)
    poly = t * (_ERF_A[0] + t * (_ERF_A[1] + t * (_ERF_A[2]
               + t * (_ERF_A[3] + t * _ERF_A[4]))))
    return s * (1.0 - poly * jnp.exp(-z * z))


def _gelu_exact_in_kernel(x):
    # nn.GELU() default == exact (erf) formulation.
    return 0.5 * x * (1.0 + _erf_approx(x * 0.7071067811865476))


# ----------------------------------------------------------------------------
# Strategy 1: single-pass resident-slab kernel (x read from HBM exactly once).
# ----------------------------------------------------------------------------
def _slab_kernel(x_ref, w1_ref, w2_ref, o_ref, *, chunk):
    # x_ref: (K, HW, C)   w1_ref: (C, C)   w2_ref: (C, K*C)   o_ref: (HW, C)
    k, hw, c = x_ref.shape
    n_chunks = hw // chunk
    unroll = n_chunks <= 8

    # --- Pooled descriptor, CHUNKED fp32 accumulation (no slab-sized fp32
    #     temporary; live range bounded to ~chunk*C*4 bytes per split). ---
    def pool_body(ci, acc):
        start = pl.multiple_of(ci * chunk, chunk)
        sl = pl.ds(start, chunk)
        for i in range(k):
            acc = acc + jnp.sum(x_ref[i, sl, :].astype(jnp.float32),
                                axis=0, keepdims=True)
        return acc

    a = jax.lax.fori_loop(0, n_chunks, pool_body,
                          jnp.zeros((1, c), jnp.float32), unroll=unroll)

    # --- Tiny MLP + softmax over the K splits (all on a (1, C) row). ---
    h1 = _gelu_exact_in_kernel(
        jnp.dot(a.astype(w1_ref.dtype), w1_ref[...],
                preferred_element_type=jnp.float32))
    hat = jnp.dot(h1.astype(w2_ref.dtype), w2_ref[...],
                  preferred_element_type=jnp.float32)            # (1, K*C)

    rows = [hat[:, i * c:(i + 1) * c] for i in range(k)]          # lane-aligned
    m = rows[0]
    for r in rows[1:]:
        m = jnp.maximum(m, r)
    exps = [jnp.exp(r - m) for r in rows]
    denom = exps[0]
    for e in exps[1:]:
        denom = denom + e
    scales = [e / denom for e in exps]                            # exact, fp32

    # Hoist the K sublane broadcasts out of the store loop (no per-iter
    # re-materialized broadcast_in_dim).
    scales_b = [pl.broadcast_to(s, (chunk, c)) for s in scales]

    # --- Weighted sum, stored chunk-by-chunk (lane-dense stores, bounded
    #     fp32 temporaries). ---
    def apply_body(ci, carry):
        start = pl.multiple_of(ci * chunk, chunk)
        sl = pl.ds(start, chunk)
        acc = scales_b[0] * x_ref[0, sl, :].astype(jnp.float32)
        for i in range(1, k):
            acc = acc + scales_b[i] * x_ref[i, sl, :].astype(jnp.float32)
        o_ref[sl, :] = acc.astype(o_ref.dtype)
        return carry

    jax.lax.fori_loop(0, n_chunks, apply_body, 0, unroll=unroll)


def _split_attention_single_pass(x_r, w1, w2, *, chunk, vmem_limit):
    b, k, hw, c = x_r.shape
    itemsize = jnp.dtype(x_r.dtype).itemsize
    w_itemsize = jnp.dtype(w1.dtype).itemsize
    kernel = functools.partial(_slab_kernel, chunk=chunk)
    return pl.pallas_call(
        kernel,
        out_shape=jax.ShapeDtypeStruct((b, hw, c), x_r.dtype),
        grid=(b,),
        in_specs=[
            pl.BlockSpec((None, k, hw, c), lambda i: (i, 0, 0, 0)),
            pl.BlockSpec((c, c), lambda i: (0, 0)),
            pl.BlockSpec((c, k * c), lambda i: (0, 0)),
        ],
        out_specs=pl.BlockSpec((None, hw, c), lambda i: (i, 0, 0)),
        compiler_params=pltpu.CompilerParams(
            dimension_semantics=("parallel",),
            vmem_limit_bytes=int(vmem_limit)),
        cost_estimate=pl.CostEstimate(
            flops=int(b * (3 * k * hw * c + 2 * c * c + 2 * c * k * c
                           + 6 * k * c)),
            transcendentals=int(b * (c + k * c)),
            bytes_accessed=int(b * (k * hw * c + hw * c) * itemsize
                               + (c * c + c * k * c) * w_itemsize)),
    )(x_r, w1, w2)


# ----------------------------------------------------------------------------
# Strategy 2: two-pass HW-tiled kernels.
# ----------------------------------------------------------------------------
def _reduce_kernel(x_ref, o_ref, *, chunk):
    # x_ref: (ROWS, C) contiguous slice of the fused (K*HW) axis.
    # o_ref: (1, C) fp32 partial sum for this (batch, tile).
    rows, c = x_ref.shape
    n_chunks = rows // chunk

    def body(ci, acc):
        start = pl.multiple_of(ci * chunk, chunk)
        return acc + jnp.sum(x_ref[pl.ds(start, chunk), :].astype(jnp.float32),
                             axis=0, keepdims=True)

    o_ref[...] = jax.lax.fori_loop(0, n_chunks, body,
                                   jnp.zeros((1, c), jnp.float32),
                                   unroll=(n_chunks <= 8))


def _apply_kernel(x_ref, bar_ref, o_ref, *, chunk):
    # x_ref: (K, TILE, C)   bar_ref: (K, C) fp32   o_ref: (TILE, C)
    k, tile_hw, c = x_ref.shape
    n_chunks = tile_hw // chunk

    # Hoist per-split broadcasts of the channel weights.
    scales_b = [pl.broadcast_to(bar_ref[i:i + 1, :], (chunk, c))
                for i in range(k)]

    def body(ci, carry):
        start = pl.multiple_of(ci * chunk, chunk)
        sl = pl.ds(start, chunk)
        acc = scales_b[0] * x_ref[0, sl, :].astype(jnp.float32)
        for i in range(1, k):
            acc = acc + scales_b[i] * x_ref[i, sl, :].astype(jnp.float32)
        o_ref[sl, :] = acc.astype(o_ref.dtype)
        return carry

    jax.lax.fori_loop(0, n_chunks, body, 0, unroll=(n_chunks <= 8))


def _split_attention_two_pass(x_r, w1, w2, *, tile_hw, reduce_rows,
                              chunk_cap, vmem_budget):
    b, k, hw, c = x_r.shape
    itemsize = jnp.dtype(x_r.dtype).itemsize
    mult = _sublane_multiple(x_r.dtype)

    # ---- Pass 1: pooled descriptor over the fused contiguous (K*HW, C) axis.
    #      Per-tile partial sums -> fully parallel grid (both v7x TCs busy
    #      even at B=1); final tiny reduction over tiles done in XLA. ----
    rows_total = k * hw
    x_flat = x_r.reshape(b, rows_total, c)
    n_tiles1 = rows_total // reduce_rows
    chunk1 = _aligned_divisor(reduce_rows, chunk_cap, mult)
    vmem1 = min(vmem_budget * 9 // 10,
                2 * reduce_rows * c * itemsize + 4 * chunk1 * c * 4 + (2 << 20))
    partials = pl.pallas_call(
        functools.partial(_reduce_kernel, chunk=chunk1),
        out_shape=jax.ShapeDtypeStruct((b, n_tiles1, 1, c), jnp.float32),
        grid=(b, n_tiles1),
        in_specs=[pl.BlockSpec((None, reduce_rows, c),
                               lambda bi, ti: (bi, ti, 0))],
        out_specs=pl.BlockSpec((None, None, 1, c),
                               lambda bi, ti: (bi, ti, 0, 0)),
        compiler_params=pltpu.CompilerParams(
            dimension_semantics=("parallel", "parallel"),
            vmem_limit_bytes=int(max(vmem1, 4 << 20))),
        cost_estimate=pl.CostEstimate(
            flops=int(b * rows_total * c),
            transcendentals=0,
            bytes_accessed=int(b * rows_total * c * itemsize
                               + b * n_tiles1 * c * 4)),
    )(x_flat)
    a = jnp.sum(partials, axis=(1, 2))                     # (B, C) fp32

    # ---- Tiny MLP + softmax in plain XLA (exact erf GELU). ----
    h1 = jax.nn.gelu(jnp.dot(a.astype(w1.dtype), w1,
                             preferred_element_type=jnp.float32),
                     approximate=False)
    hat = jnp.dot(h1.astype(w2.dtype), w2, preferred_element_type=jnp.float32)
    bar = jax.nn.softmax(hat.reshape(b, k, c), axis=1)     # (B, K, C) fp32

    # ---- Pass 2: apply per-(batch, split) channel weights, tiled over HW. --
    n_tiles2 = hw // tile_hw
    chunk2 = _aligned_divisor(tile_hw, chunk_cap, mult)
    in_blk = k * tile_hw * c * itemsize
    out_blk = tile_hw * c * itemsize
    vmem2 = min(vmem_budget * 9 // 10,
                2 * in_blk + 2 * out_blk + (k + 3) * chunk2 * c * 4
                + 2 * k * c * 4 + (2 << 20))
    out = pl.pallas_call(
        functools.partial(_apply_kernel, chunk=chunk2),
        out_shape=jax.ShapeDtypeStruct((b, hw, c), x_r.dtype),
        grid=(b, n_tiles2),
        in_specs=[
            pl.BlockSpec((None, k, tile_hw, c), lambda bi, ti: (bi, 0, ti, 0)),
            pl.BlockSpec((None, k, c), lambda bi, ti: (bi, 0, 0)),
        ],
        out_specs=pl.BlockSpec((None, tile_hw, c), lambda bi, ti: (bi, ti, 0)),
        compiler_params=pltpu.CompilerParams(
            dimension_semantics=("parallel", "parallel"),
            vmem_limit_bytes=int(max(vmem2, 4 << 20))),
        cost_estimate=pl.CostEstimate(
            flops=int(2 * b * k * hw * c),
            transcendentals=0,
            bytes_accessed=int(b * (k * hw * c + hw * c) * itemsize
                               + b * k * c * 4)),
    )(x_r, bar)
    return out


# ----------------------------------------------------------------------------
# Dispatcher.
# ----------------------------------------------------------------------------
def split_attention(x_all, w1, w2, *,
                    force_two_pass=False, force_single_pass=False,
                    tile_hw=None, reduce_rows=None, vmem_cap_bytes=None):
    """x_all: (B, K, H, W, C);  w1: (C, C);  w2: (C, K*C) -> (B, H, W, C)."""
    b, k, h, w, c = x_all.shape
    hw = h * w
    x_r = x_all.reshape(b, k, hw, c)

    itemsize = jnp.dtype(x_all.dtype).itemsize
    w_itemsize = jnp.dtype(w1.dtype).itemsize
    mult = _sublane_multiple(x_all.dtype)
    budget = _vmem_capacity_bytes(vmem_cap_bytes)

    chunk_cap = 512                     # sublane rows per in-kernel work chunk
    chunk_sp = _aligned_divisor(hw, chunk_cap, mult)

    # Honest single-pass VMEM estimate: double-buffered slab + output blocks +
    # weights + chunk-bounded fp32 temporaries (no slab-sized fp32 temp).
    slab_bytes = (2 * k * hw * c * itemsize
                  + 2 * hw * c * itemsize
                  + 2 * (c * c + c * k * c) * w_itemsize
                  + (2 * k + 4) * chunk_sp * c * 4
                  + 64 * k * c * 4
                  + (2 << 20))

    # Small B: prefer the two-pass (B, tiles) grid — the single-pass grid=(B,)
    # has only B pipeline stages (exposed first-slab DMA) and, on v7x, would
    # leave one TensorCore idle at B=1.
    use_single = force_single_pass or (
        (not force_two_pass) and slab_bytes <= (3 * budget) // 4 and b > 2)

    if use_single:
        vmem_limit = min(max(slab_bytes * 5 // 4, 16 << 20),
                         budget * 9 // 10, 128 << 20)
        out = _split_attention_single_pass(
            x_r, w1, w2, chunk=chunk_sp, vmem_limit=vmem_limit)
    else:
        target = 6 << 20                # ~6 MiB input blocks per grid step
        if tile_hw is None:
            tile_hw = _aligned_divisor(
                hw, max(mult, target // max(1, k * c * itemsize)), mult)
        assert hw % tile_hw == 0, "tile_hw must divide H*W"
        if reduce_rows is None:
            reduce_rows = _aligned_divisor(
                k * hw, max(mult, target // max(1, c * itemsize)), mult)
        assert (k * hw) % reduce_rows == 0, "reduce_rows must divide K*H*W"
        out = _split_attention_two_pass(
            x_r, w1, w2, tile_hw=tile_hw, reduce_rows=reduce_rows,
            chunk_cap=chunk_cap, vmem_budget=budget)

    return out.reshape(b, h, w, c)


def split_attention_ref(x_all, w1, w2):
    b, k, h, w, c = x_all.shape
    x = x_all.reshape(b, k, -1, c)
    a = jnp.sum(jnp.sum(x, axis=1), axis=1)                        # (B, C)
    h1 = jax.nn.gelu(a @ w1, approximate=False)
    hat = (h1 @ w2).reshape(b, k, c)
    bar = jax.nn.softmax(hat, axis=1)
    out = jnp.sum(bar[:, :, None, :] * x, axis=1).reshape(b, h, w, c)
    return out


if __name__ == "__main__":
    # Small stand-in for channel=512, k=3 (C kept a multiple of 128 so the
    # K-wise lane slices of hat and all stores stay lane-aligned).
    B, K, H, W, C = 2, 3, 16, 16, 128

    key = jax.random.PRNGKey(0)
    kx, k1, k2 = jax.random.split(key, 3)
    x = jax.random.normal(kx, (B, K, H, W, C), jnp.float32)
    # Linear(channel, channel, bias=False) / Linear(channel, channel*k,
    # bias=False), stored as (in, out).
    w1 = 0.05 * jax.random.normal(k1, (C, C), jnp.float32)
    w2 = 0.05 * jax.random.normal(k2, (C, K * C), jnp.float32)

    ref = split_attention_ref(x, w1, w2)

    # Default dispatch (B<=2 -> two-pass HW-tiled path).
    out0 = split_attention(x, w1, w2)
    jax.block_until_ready(out0)
    assert out0.shape == (B, H, W, C)
    assert jnp.allclose(out0, ref, atol=2e-3, rtol=2e-3), "default path mismatch"

    # Forced two-pass with small tiles: exercises multi-tile partial sums in
    # pass 1 and multi-tile application in pass 2.
    out1 = split_attention(x, w1, w2, force_two_pass=True,
                           tile_hw=64, reduce_rows=192)
    jax.block_until_ready(out1)
    assert jnp.allclose(out1, ref, atol=2e-3, rtol=2e-3), "two-pass mismatch"

    # Forced single-pass resident-slab kernel (what large-B shapes that fit
    # VMEM dispatch to): whole (K, HW, C) slab read from HBM exactly once.
    out2 = split_attention(x, w1, w2, force_single_pass=True)
    jax.block_until_ready(out2)
    assert jnp.allclose(out2, ref, atol=2e-3, rtol=2e-3), "single-pass mismatch"

    print("KERNEL_OK")
</pallas_src>

<mosaic_0001>
module attributes {stable_mosaic.version = 11 : i64} {
  func.func @_reduce_kernel(%arg0: i32, %arg1: i32, %arg2: memref<1x768x128xf32, #tpu.memory_space<vmem>>, %arg3: memref<1x1x1x128xf32, #tpu.memory_space<vmem>>) attributes {dimension_semantics = [#tpu.dimension_semantics<parallel>, #tpu.dimension_semantics<parallel>], iteration_bounds = array<i64: 2, 1>, scalar_prefetch = 0 : i64, scratch_operands = 0 : i64, tpu.core_type = #tpu.core_type<tc>, window_params = [{transform_indices = @transform_0, window_bounds = array<i64: 1, 768, 128>}, {transform_indices = @transform_1, window_bounds = array<i64: 1, 1, 1, 128>}]} {
    %cst = arith.constant 0.000000e+00 : f32
    %0 = vector.broadcast %cst : f32 to vector<1x128xf32>
    %c0_i32 = arith.constant 0 : i32
    %c384_i32 = arith.constant 384 : i32
    %1 = arith.muli %c0_i32, %c384_i32 : i32
    %2 = tpu.assume_multiple %1, 384 : i32
    %c0 = arith.constant 0 : index
    %3 = arith.index_cast %2 : i32 to index
    %c0_0 = arith.constant 0 : index
    %4 = vector.load %arg2[%c0, %3, %c0_0] : memref<1x768x128xf32, #tpu.memory_space<vmem>>, vector<1x384x128xf32>
    %5 = vector.shape_cast %4 : vector<1x384x128xf32> to vector<384x128xf32>
    %cst_1 = arith.constant dense<0.000000e+00> : vector<128xf32>
    %6 = vector.multi_reduction <add>, %5, %cst_1 [0] : vector<384x128xf32> to vector<128xf32>
    %7 = vector.shape_cast %6 : vector<128xf32> to vector<1x128xf32>
    %8 = arith.addf %0, %7 : vector<1x128xf32>
    %c1_i32 = arith.constant 1 : i32
    %c384_i32_2 = arith.constant 384 : i32
    %9 = arith.muli %c1_i32, %c384_i32_2 : i32
    %10 = tpu.assume_multiple %9, 384 : i32
    %c0_3 = arith.constant 0 : index
    %11 = arith.index_cast %10 : i32 to index
    %c0_4 = arith.constant 0 : index
    %12 = vector.load %arg2[%c0_3, %11, %c0_4] : memref<1x768x128xf32, #tpu.memory_space<vmem>>, vector<1x384x128xf32>
    %13 = vector.shape_cast %12 : vector<1x384x128xf32> to vector<384x128xf32>
    %cst_5 = arith.constant dense<0.000000e+00> : vector<128xf32>
    %14 = vector.multi_reduction <add>, %13, %cst_5 [0] : vector<384x128xf32> to vector<128xf32>
    %15 = vector.shape_cast %14 : vector<128xf32> to vector<1x128xf32>
    %16 = arith.addf %8, %15 : vector<1x128xf32>
    %c2_i32 = arith.constant 2 : i32
    %c0_6 = arith.constant 0 : index
    %c0_7 = arith.constant 0 : index
    %c0_8 = arith.constant 0 : index
    %c0_9 = arith.constant 0 : index
    %17 = vector.load %arg3[%c0_6, %c0_7, %c0_8, %c0_9] : memref<1x1x1x128xf32, #tpu.memory_space<vmem>>, vector<1x1x1x128xf32>
    %18 = vector.shape_cast %17 : vector<1x1x1x128xf32> to vector<1x128xf32>
    %19 = vector.shape_cast %16 : vector<1x128xf32> to vector<1x1x1x128xf32>
    tpu.vector_store %arg3[%c0_6, %c0_7, %c0_8, %c0_9], %19 {strides = array<i32>} : memref<1x1x1x128xf32, #tpu.memory_space<vmem>>, vector<1x1x1x128xf32>,
    return
  }
  func.func @transform_0(%arg0: i32, %arg1: i32) -> (i32, i32, i32) {
    %c0_i32 = arith.constant 0 : i32
    %c0_i32_0 = arith.constant 0 : i32
    return %arg0, %arg1, %c0_i32 : i32, i32, i32
  }
  func.func @transform_1(%arg0: i32, %arg1: i32) -> (i32, i32, i32, i32) {
    %c0_i32 = arith.constant 0 : i32
    %c0_i32_0 = arith.constant 0 : i32
    %c0_i32_1 = arith.constant 0 : i32
    return %arg0, %arg1, %c0_i32, %c0_i32_0 : i32, i32, i32, i32
  }
}

</mosaic_0001>

<bundles_post_ra>
// kernel: tpu_custom_call.1
= control target key start
LH: loop header
LB: loop body
LE: loop exit
PB: predicated region body
PF: predicated region fallthrough
CT: control target
= control target key end

     0   :  { %6 = vsyncpa [#allocation3], 0  ;;  %s975_s0 = inlined_call_operand.hbm [shape: f32[2,768,128], index: 0, kind: input, shape index: {}]   ;;  %s976_s1 = inlined_call_operand.hbm [shape: f32[2,1,1,128], index: 1, kind: output, shape index: {}]  }
   0x1   :  { %8 = vsyncpa [#allocation3 + $0x1], 0 }
   0x2   :  { %9 = vsyncpa [#allocation4], 0 }
   0x3   :  { %11 = vsyncpa [#allocation4 + $0x1], 0  ;;  %s703_s6 = smov 0   ;;  %s705_s7 = smov 0  }
   0x4   :  { %s707_s8 = smov 0   ;;  %s709_s9 = smov 0  }
   0x5   :  { %s711_s10 = smov 0   ;;  %s713_s11 = smov 0  }
   0x6 LB: > { %s451_s12 = sadd.s32 4294967295, %s687_s11   ;;  %s452_s13 = sadd.s32 4294967294, %s687_s11   ;;  %s687_s11 = sphi %s713_s11, %s17_s11   ;;  %s683_s10 = sphi %s711_s10, %s991_s10   ;;  %s679_s9 = sphi %s709_s9, %s990_s9   ;;  %s675_s8 = sphi %s707_s8, %s989_s8   ;;  %s671_s7 = sphi %s705_s7, %s988_s7   ;;  %s667_s6 = sphi %s703_s6, %s987_s6  }
   0x7   : > { %s29_s14 = sadd.s32 1, %s683_s10  ;;  %s38_s15 = sadd.s32 1, %s675_s8 }
   0x8   : > { %p31_p0 = scmp.ge.s32.totalorder %s29_s14, 2  ;;  %p45_p1 = scmp.ne.s32.totalorder %s675_s8, %s671_s7 }
   0x9   : > { %p46_p2 = scmp.eq.s32.totalorder %s687_s11, 0  ;;  %p51_p3 = scmp.ne.s32.totalorder %s671_s7, %s667_s6 }
   0xa   : > { %s993_s14 = smov (%p31_p0, %s29_s14), 0  ;;  %p52_p5 = scmp.eq.s32.totalorder %s451_s12, 0 }
   0xb   : > { %p744_p4 = por %p46_p2, %p45_p1  ;;  %s33_s17 = ssub.s32 %s683_s10, %s993_s14 }
   0xc   : > { %p77_p6 = scmp.eq.s32.totalorder %s451_s12, 1  ;;  %p36_p7 = scmp.eq.s32.totalorder %s33_s17, 0 }
   0xd   : > { %p750_p8 = por %p52_p5, %p51_p3  ;;  %p83_p10 = scmp.eq.s32.totalorder %s452_s13, 1 }
   0xe   : > { %p754_p9 = por %p77_p6, %p45_p1  ;;  %p523_p13 = scmp.lt.s32.totalorder %s687_s11, 2 }
   0xf   : > { %s759_s20 = scalar_select %p36_p7, %s675_s8, %s38_s15  }
  0x10   : > { %s980_s19 = scalar_select %p754_p9, 1, 0 }
  0x11   : > { %p761_p11 = por %p83_p10, %p51_p3  ;;  %s103_s22 = sand.u32 1, %s675_s8  }
  0x12   : > { %s508_s23 = smul.u32 768, %s103_s22  ;;  %p771_p0 = pnand %p523_p13, %p744_p4 }
  0x13   : > { %s981_s21 = scalar_select %p761_p11, 1, 0 }
  0x14   : > { %s509_s24 = smul.u32 12288, %s683_s10  ;;  %s107_s29 = scalar_lea.vmem [#allocation2], %s508_s23 }
  0x15   : > { %s116_s30 = sshll.u32 %s107_s29, 4  ;;  %s783_s2 = scalar_lea.sflag [#allocation3], %s103_s22  ;;  %s780_s30 = int_to_ptr.vmem [resolvable:$true] %s116_s30 }
  0x16   : > { %s778_s28 = scalar_lea.hbm %s975_s0, %s509_s24  ;;  %p577_p3 = pneg %p771_p0 }
  0x17   : > { %s575_s3 = scalar_lea.hbm %s778_s28, 12288  ;;  %s580_s12 = scalar_lea.hbm %s975_s0, 24576 }
  0x18   : > { %p576_p2 = scmp.ne.s32.totalorder %s778_s28, %s575_s3  ;;  %p581_p6 = scmp.lt.u32.totalorder %s778_s28, %s975_s0 }
  0x19   : > { %p582_p7 = scmp.lt.u32.totalorder %s580_s12, %s575_s3  ;;  %p584_p13 = scmp.lt.u32.totalorder %s575_s3, %s778_s28 }
  0x1a   : > { %p578_p4 = pnand %p577_p3, %p576_p2 }
  0x1b   : > { %p583_p10 = por %p582_p7, %p581_p6 }
  0x1c   : > { %p579_p5 = pneg %p578_p4 }
  0x1d   : > { %p585_p12 = por %p584_p13, %p583_p10 }
  0x1f   : > { %p586_p1 = pnand %p585_p12, %p579_p5 }
  0x21   : > { %589 = shalt.err (!%p586_p1)
}
  0x22   : > { %s590_s16 = scalar_lea.vmem %s780_s30, 12288  ;;  %s689_s17 = smov [#allocation2]  }
  0x23   : > { %p591_p2 = scmp.ne.s32.totalorder %s780_s30, %s590_s16  ;;  %s595_s22 = sshll.u32 %s689_s17, 4  ;;  %s596_s22 = int_to_ptr.vmem [resolvable:$false] %s595_s22 }
  0x24   : > { %s597_s23 = scalar_lea.vmem %s596_s22, 24576  ;;  %p598_p9 = scmp.lt.s32.totalorder %s780_s30, %s596_s22 }
  0x25   : > { %p593_p4 = pnand %p591_p2, %p577_p3  ;;  %p599_p6 = scmp.lt.s32.totalorder %s597_s23, %s590_s16 }
  0x27   : > { %p594_p11 = pneg %p593_p4  ;;  %p600_p7 = por %p599_p6, %p598_p9 }
  0x29   : > { %p601_p10 = pnand %p600_p7, %p594_p11 }
  0x2b   : > { %604 = shalt.err (!%p601_p10)
}
  0x2c   : > { %s690_s24 = smov 128   ;;  %s691_s26 = smov 8  }
  0x2d   : > { %518 = dma.hbm_to_vmem [thread:$0]  (!%p771_p0), %s778_s28, 12288, %s780_s30, %s783_s2, %s690_s24, %s690_s24, %s691_s26  }
  0x2e   : > { %p124_p12 = scmp.lt.s32.totalorder %s687_s11, 3  ;;  %p983_p1 = scmp.ge.s32.totalorder %s687_s11, 1 }
  0x30   : > { %p125_p3 = pnand %p983_p1, %p124_p12 }
  0x31   : > { %s815_s27 = sand.u32 (!%p125_p3), 1, %s671_s7  }
  0x32   : > { %128 = sbr.rel (%p125_p3) target bundleno = 185 (0xb9), region = 24  ;;  %s131_s3 = scalar_lea.sflag (!%p125_p3), [#allocation3], %s815_s27 }
  0x33   : > { %s510_s29 = smul.u32 (!%p125_p3), 768, %s815_s27 }
  0x35   : > { %s819_s4 = scalar_lea.vmem (!%p125_p3), [#allocation2], %s510_s29 }
  0x39   : > { %658 = dma.done.wait (%p750_p8), %s131_s3, 12288  }
  0x3a   : > { %660 = vsyncadd (%p750_p8), %s131_s3, 4294955008  ;;  %v153_v0 = vld [vmem:[%s819_s4] sm:$0xff]  ;;  %v154_v1 = vld [vmem:[%s819_s4 + $0x8] sm:$0xff]  ;;  %s505_s18 = sshll.u32 %s679_s9, 4  ;;  %s151_s25 = scalar_lea.vmem [#allocation5], %s815_s27 }
  0x3b   : > { %v155_v2 = vld [vmem:[%s819_s4 + $0x10] sm:$0xff]  ;;  %v201_v3 = vadd.f32 %v154_v1, %v153_v0  ;;  %v156_v4 = vld [vmem:[%s819_s4 + $0x18] sm:$0xff]  ;;  %v157_v6 = vld [vmem:[%s819_s4 + $0x20] sm:$0xff]  ;;  %s373_s28 = sshll.u32 %s151_s25, 4  ;;  %s926_s5 = scalar_lea.hbm %s976_s1, %s505_s18  ;;  %s928_s28 = int_to_ptr.vmem [resolvable:$true] %s373_s28 }
  0x3c   : > { %v158_v8 = vld [vmem:[%s819_s4 + $0x28] sm:$0xff]  ;;  %v159_v10 = vld [vmem:[%s819_s4 + $0x30] sm:$0xff]  ;;  %v160_v12 = vld [vmem:[%s819_s4 + $0x38] sm:$0xff]  ;;  %s360_s12 = scalar_lea.sflag [#allocation4], %s815_s27  ;;  %s605_s13 = scalar_lea.vmem %s928_s28, 16 }
  0x3d   : > { %v202_v5 = vadd.f32 %v201_v3, %v155_v2  ;;  %v161_v14 = vld [vmem:[%s819_s4 + $0x40] sm:$0xff]  ;;  %v162_v16 = vld [vmem:[%s819_s4 + $0x48] sm:$0xff]  ;;  %v163_v17 = vld [vmem:[%s819_s4 + $0x50] sm:$0xff]  ;;  %p606_p8 = scmp.ne.s32.totalorder %s928_s28, %s605_s13  ;;  %p984_p9 = scmp.ne.s32.totalorder %s980_s19, 0 }
  0x3e   : > { %v457_v19 = vld [vmem:[%s819_s4 + $0x180] sm:$0xff]  ;;  %v458_v20 = vld [vmem:[%s819_s4 + $0x188] sm:$0xff]  ;;  %v459_v21 = vld [vmem:[%s819_s4 + $0x190] sm:$0xff]  ;;  %s692_s9 = smov [#allocation5]  }
  0x3f   : > { %v203_v7 = vadd.f32 %v202_v5, %v156_v4  ;;  %v304_v23 = vadd.f32 %v458_v20, %v457_v19  ;;  %v164_v24 = vld [vmem:[%s819_s4 + $0x58] sm:$0xff]  ;;  %v165_v28 = vld [vmem:[%s819_s4 + $0x60] sm:$0xff]  ;;  %v166_v32 = vld [vmem:[%s819_s4 + $0x68] sm:$0xff]  ;;  %p607_p11 = pnand %p606_p8, %p984_p9  ;;  %s609_s15 = sshll.u32 %s692_s9, 4  ;;  %s610_s15 = int_to_ptr.vmem [resolvable:$false] %s609_s15 }
  0x40   : > { %v460_v25 = vld [vmem:[%s819_s4 + $0x198] sm:$0xff]  ;;  %v461_v29 = vld [vmem:[%s819_s4 + $0x1a0] sm:$0xff]  ;;  %v462_v33 = vld [vmem:[%s819_s4 + $0x1a8] sm:$0xff]  ;;  %s611_s16 = scalar_lea.vmem %s610_s15, 32  ;;  %p612_p5 = scmp.lt.s32.totalorder %s928_s28, %s610_s15 }
  0x41   : > { %v204_v9 = vadd.f32 %v203_v7, %v157_v6  ;;  %v305_v27 = vadd.f32 %v459_v21, %v304_v23  ;;  %v167_v36 = vld [vmem:[%s819_s4 + $0x70] sm:$0xff]  ;;  %v168_v40 = vld [vmem:[%s819_s4 + $0x78] sm:$0xff]  ;;  %v169_v44 = vld [vmem:[%s819_s4 + $0x80] sm:$0xff]  ;;  %p608_p0 = pneg %p607_p11  ;;  %p613_p13 = scmp.lt.s32.totalorder %s611_s16, %s605_s13 }
  0x42   : > { %v463_v37 = vld [vmem:[%s819_s4 + $0x1b0] sm:$0xff]  ;;  %v464_v41 = vld [vmem:[%s819_s4 + $0x1b8] sm:$0xff]  ;;  %v465_v45 = vld [vmem:[%s819_s4 + $0x1c0] sm:$0xff] }
  0x43   : > { %v205_v11 = vadd.f32 %v204_v9, %v158_v8  ;;  %v306_v31 = vadd.f32 %v460_v25, %v305_v27  ;;  %v170_v48 = vld [vmem:[%s819_s4 + $0x88] sm:$0xff]  ;;  %v171_v52 = vld [vmem:[%s819_s4 + $0x90] sm:$0xff]  ;;  %v172_v56 = vld [vmem:[%s819_s4 + $0x98] sm:$0xff]  ;;  %p614_p2 = por %p613_p13, %p612_p5 }
  0x44   : > { %v466_v49 = vld [vmem:[%s819_s4 + $0x1c8] sm:$0xff]  ;;  %v467_v53 = vld [vmem:[%s819_s4 + $0x1d0] sm:$0xff]  ;;  %v468_v57 = vld [vmem:[%s819_s4 + $0x1d8] sm:$0xff] }
  0x45   : > { %v206_v13 = vadd.f32 %v205_v11, %v159_v10  ;;  %v307_v35 = vadd.f32 %v461_v29, %v306_v31  ;;  %v173_v60 = vld [vmem:[%s819_s4 + $0xa0] sm:$0xff]  ;;  %v174_v0 = vld [vmem:[%s819_s4 + $0xa8] sm:$0xff]  ;;  %v175_v4 = vld [vmem:[%s819_s4 + $0xb0] sm:$0xff]  ;;  %p615_p4 = pnand %p614_p2, %p608_p0 }
  0x46   : > { %v469_v61 = vld [vmem:[%s819_s4 + $0x1e0] sm:$0xff]  ;;  %v470_v1 = vld [vmem:[%s819_s4 + $0x1e8] sm:$0xff]  ;;  %v471_v5 = vld [vmem:[%s819_s4 + $0x1f0] sm:$0xff] }
  0x47   : > { %v207_v15 = vadd.f32 %v206_v13, %v160_v12  ;;  %v308_v39 = vadd.f32 %v462_v33, %v307_v35  ;;  %v176_v8 = vld [vmem:[%s819_s4 + $0xb8] sm:$0xff]  ;;  %v177_v12 = vld [vmem:[%s819_s4 + $0xc0] sm:$0xff]  ;;  %v179_v20 = vld [vmem:[%s819_s4 + $0xd0] sm:$0xff] }
  0x48   : > { %v472_v9 = vld [vmem:[%s819_s4 + $0x1f8] sm:$0xff]  ;;  %v473_v13 = vld [vmem:[%s819_s4 + $0x200] sm:$0xff]  ;;  %v475_v21 = vld [vmem:[%s819_s4 + $0x210] sm:$0xff] }
  0x49   : > { %v208_v18 = vadd.f32 %v207_v15, %v161_v14  ;;  %v309_v43 = vadd.f32 %v463_v37, %v308_v39  ;;  %v476_v25 = vld [vmem:[%s819_s4 + $0x218] sm:$0xff]  ;;  %v477_v29 = vld [vmem:[%s819_s4 + $0x220] sm:$0xff]  ;;  %v478_v33 = vld [vmem:[%s819_s4 + $0x228] sm:$0xff] }
  0x4a   : > { %v479_v37 = vld [vmem:[%s819_s4 + $0x230] sm:$0xff] }
  0x4b   : > { %v209_v22 = vadd.f32 %v208_v18, %v162_v16  ;;  %v310_v47 = vadd.f32 %v464_v41, %v309_v43  ;;  %v178_v16 = vld [vmem:[%s819_s4 + $0xc8] sm:$0xff]  ;;  %v480_v41 = vld [vmem:[%s819_s4 + $0x238] sm:$0xff] }
  0x4d   : > { %v210_v26 = vadd.f32 %v209_v22, %v163_v17  ;;  %v311_v51 = vadd.f32 %v465_v45, %v310_v47  ;;  %v474_v17 = vld [vmem:[%s819_s4 + $0x208] sm:$0xff]  ;;  %v481_v45 = vld [vmem:[%s819_s4 + $0x240] sm:$0xff] }
  0x4f   : > { %v211_v30 = vadd.f32 %v210_v26, %v164_v24  ;;  %v312_v55 = vadd.f32 %v466_v49, %v311_v51  ;;  %v180_v24 = vld [vmem:[%s819_s4 + $0xd8] sm:$0xff]  ;;  %v482_v49 = vld [vmem:[%s819_s4 + $0x248] sm:$0xff] }
  0x51   : > { %v212_v34 = vadd.f32 %v211_v30, %v165_v28  ;;  %v313_v59 = vadd.f32 %v467_v53, %v312_v55  ;;  %v181_v28 = vld [vmem:[%s819_s4 + $0xe0] sm:$0xff]  ;;  %v483_v53 = vld [vmem:[%s819_s4 + $0x250] sm:$0xff] }
  0x53   : > { %v213_v38 = vadd.f32 %v212_v34, %v166_v32  ;;  %v314_v63 = vadd.f32 %v468_v57, %v313_v59  ;;  %v182_v32 = vld [vmem:[%s819_s4 + $0xe8] sm:$0xff]  ;;  %v484_v57 = vld [vmem:[%s819_s4 + $0x258] sm:$0xff] }
  0x55   : > { %v214_v42 = vadd.f32 %v213_v38, %v167_v36  ;;  %v315_v3 = vadd.f32 %v469_v61, %v314_v63  ;;  %v183_v36 = vld [vmem:[%s819_s4 + $0xf0] sm:$0xff]  ;;  %v485_v61 = vld [vmem:[%s819_s4 + $0x260] sm:$0xff] }
  0x57   : > { %v215_v46 = vadd.f32 %v214_v42, %v168_v40  ;;  %v316_v7 = vadd.f32 %v470_v1, %v315_v3  ;;  %v184_v40 = vld [vmem:[%s819_s4 + $0xf8] sm:$0xff]  ;;  %v486_v1 = vld [vmem:[%s819_s4 + $0x268] sm:$0xff] }
  0x59   : > { %v216_v50 = vadd.f32 %v215_v46, %v169_v44  ;;  %v317_v11 = vadd.f32 %v471_v5, %v316_v7  ;;  %v185_v44 = vld [vmem:[%s819_s4 + $0x100] sm:$0xff]  ;;  %v487_v5 = vld [vmem:[%s819_s4 + $0x270] sm:$0xff] }
  0x5b   : > { %v217_v54 = vadd.f32 %v216_v50, %v170_v48  ;;  %v318_v15 = vadd.f32 %v472_v9, %v317_v11  ;;  %v186_v48 = vld [vmem:[%s819_s4 + $0x108] sm:$0xff]  ;;  %v488_v9 = vld [vmem:[%s819_s4 + $0x278] sm:$0xff] }
  0x5d   : > { %v218_v58 = vadd.f32 %v217_v54, %v171_v52  ;;  %v319_v19 = vadd.f32 %v473_v13, %v318_v15  ;;  %v187_v52 = vld [vmem:[%s819_s4 + $0x110] sm:$0xff]  ;;  %v489_v13 = vld [vmem:[%s819_s4 + $0x280] sm:$0xff] }
  0x5f   : > { %v219_v62 = vadd.f32 %v218_v58, %v172_v56  ;;  %v320_v23 = vadd.f32 %v474_v17, %v319_v19  ;;  %v188_v56 = vld [vmem:[%s819_s4 + $0x118] sm:$0xff]  ;;  %v490_v17 = vld [vmem:[%s819_s4 + $0x288] sm:$0xff] }
  0x61   : > { %v220_v2 = vadd.f32 %v219_v62, %v173_v60  ;;  %v321_v27 = vadd.f32 %v475_v21, %v320_v23  ;;  %v189_v60 = vld [vmem:[%s819_s4 + $0x120] sm:$0xff]  ;;  %v491_v21 = vld [vmem:[%s819_s4 + $0x290] sm:$0xff] }
  0x63   : > { %v221_v6 = vadd.f32 %v220_v2, %v174_v0  ;;  %v322_v31 = vadd.f32 %v476_v25, %v321_v27  ;;  %v190_v0 = vld [vmem:[%s819_s4 + $0x128] sm:$0xff]  ;;  %v492_v25 = vld [vmem:[%s819_s4 + $0x298] sm:$0xff] }
  0x65   : > { %v222_v10 = vadd.f32 %v221_v6, %v175_v4  ;;  %v323_v35 = vadd.f32 %v477_v29, %v322_v31  ;;  %v191_v4 = vld [vmem:[%s819_s4 + $0x130] sm:$0xff]  ;;  %v493_v29 = vld [vmem:[%s819_s4 + $0x2a0] sm:$0xff] }
  0x67   : > { %v223_v14 = vadd.f32 %v222_v10, %v176_v8  ;;  %v324_v39 = vadd.f32 %v478_v33, %v323_v35  ;;  %v192_v8 = vld [vmem:[%s819_s4 + $0x138] sm:$0xff]  ;;  %v494_v33 = vld [vmem:[%s819_s4 + $0x2a8] sm:$0xff] }
  0x69   : > { %v224_v18 = vadd.f32 %v223_v14, %v177_v12  ;;  %v325_v43 = vadd.f32 %v479_v37, %v324_v39  ;;  %v193_v12 = vld [vmem:[%s819_s4 + $0x140] sm:$0xff]  ;;  %v495_v37 = vld [vmem:[%s819_s4 + $0x2b0] sm:$0xff] }
  0x6b   : > { %v225_v22 = vadd.f32 %v224_v18, %v178_v16  ;;  %v326_v47 = vadd.f32 %v480_v41, %v325_v43  ;;  %v194_v16 = vld [vmem:[%s819_s4 + $0x148] sm:$0xff]  ;;  %v200_v43 = vld [vmem:[%s819_s4 + $0x178] sm:$0xff] }
  0x6d   : > { %v226_v26 = vadd.f32 %v225_v22, %v179_v20  ;;  %v327_v51 = vadd.f32 %v481_v45, %v326_v47  ;;  %v195_v20 = vld [vmem:[%s819_s4 + $0x150] sm:$0xff] }
  0x6f   : > { %v227_v30 = vadd.f32 %v226_v26, %v180_v24  ;;  %v328_v55 = vadd.f32 %v482_v49, %v327_v51  ;;  %v196_v24 = vld [vmem:[%s819_s4 + $0x158] sm:$0xff]  ;;  %v499_v49 = vld [vmem:[%s819_s4 + $0x2d0] sm:$0xff] }
  0x70   : > { %v500_v51 = vld [vmem:[%s819_s4 + $0x2d8] sm:$0xff] }
  0x71   : > { %v228_v34 = vadd.f32 %v227_v30, %v181_v28  ;;  %v329_v59 = vadd.f32 %v483_v53, %v328_v55  ;;  %v197_v28 = vld [vmem:[%s819_s4 + $0x160] sm:$0xff] }
  0x73   : > { %v229_v38 = vadd.f32 %v228_v34, %v182_v32  ;;  %v330_v63 = vadd.f32 %v484_v57, %v329_v59  ;;  %v198_v32 = vld [vmem:[%s819_s4 + $0x168] sm:$0xff]  ;;  %v503_v59 = vld [vmem:[%s819_s4 + $0x2f0] sm:$0xff] }
  0x75   : > { %v230_v42 = vadd.f32 %v229_v38, %v183_v36  ;;  %v331_v3 = vadd.f32 %v485_v61, %v330_v63  ;;  %v199_v36 = vld [vmem:[%s819_s4 + $0x170] sm:$0xff]  ;;  %v504_v61 = vld [vmem:[%s819_s4 + $0x2f8] sm:$0xff] }
  0x77   : > { %v231_v46 = vadd.f32 %v230_v42, %v184_v40  ;;  %v332_v7 = vadd.f32 %v486_v1, %v331_v3  ;;  %v496_v40 = vld [vmem:[%s819_s4 + $0x2b8] sm:$0xff] }
  0x79   : > { %v232_v50 = vadd.f32 %v231_v46, %v185_v44  ;;  %v333_v11 = vadd.f32 %v487_v5, %v332_v7  ;;  %v497_v44 = vld [vmem:[%s819_s4 + $0x2c0] sm:$0xff]  ;;  %v498_v46 = vld [vmem:[%s819_s4 + $0x2c8] sm:$0xff] }
  0x7b   : > { %v233_v54 = vadd.f32 %v232_v50, %v186_v48  ;;  %v334_v15 = vadd.f32 %v488_v9, %v333_v11 }
  0x7d   : > { %v234_v58 = vadd.f32 %v233_v54, %v187_v52  ;;  %v335_v19 = vadd.f32 %v489_v13, %v334_v15  ;;  %v501_v54 = vld [vmem:[%s819_s4 + $0x2e0] sm:$0xff] }
  0x7f   : > { %v235_v62 = vadd.f32 %v234_v58, %v188_v56  ;;  %v336_v23 = vadd.f32 %v490_v17, %v335_v19  ;;  %v502_v56 = vld [vmem:[%s819_s4 + $0x2e8] sm:$0xff] }
  0x81   : > { %v236_v2 = vadd.f32 %v235_v62, %v189_v60  ;;  %v337_v27 = vadd.f32 %v491_v21, %v336_v23 }
  0x83   : > { %v237_v6 = vadd.f32 %v236_v2, %v190_v0  ;;  %v338_v31 = vadd.f32 %v492_v25, %v337_v27 }
  0x85   : > { %v238_v10 = vadd.f32 %v237_v6, %v191_v4  ;;  %v339_v35 = vadd.f32 %v493_v29, %v338_v31 }
  0x87   : > { %v239_v14 = vadd.f32 %v238_v10, %v192_v8  ;;  %v340_v39 = vadd.f32 %v494_v33, %v339_v35 }
  0x89   : > { %v240_v18 = vadd.f32 %v239_v14, %v193_v12  ;;  %v341_v42 = vadd.f32 %v495_v37, %v340_v39 }
  0x8b   : > { %v241_v22 = vadd.f32 %v240_v18, %v194_v16  ;;  %v342_v45 = vadd.f32 %v496_v40, %v341_v42 }
  0x8d   : > { %v242_v26 = vadd.f32 %v241_v22, %v195_v20  ;;  %v343_v48 = vadd.f32 %v497_v44, %v342_v45 }
  0x8f   : > { %v243_v30 = vadd.f32 %v242_v26, %v196_v24  ;;  %v344_v50 = vadd.f32 %v498_v46, %v343_v48 }
  0x91   : > { %v244_v34 = vadd.f32 %v243_v30, %v197_v28  ;;  %v345_v53 = vadd.f32 %v499_v49, %v344_v50 }
  0x93   : > { %v245_v38 = vadd.f32 %v244_v34, %v198_v32  ;;  %v346_v55 = vadd.f32 %v500_v51, %v345_v53 }
  0x95   : > { %v246_v41 = vadd.f32 %v245_v38, %v199_v36  ;;  %v347_v58 = vadd.f32 %v501_v54, %v346_v55 }
  0x97   : > { %v247_v47 = vadd.f32 %v246_v41, %v200_v43  ;;  %v348_v60 = vadd.f32 %v502_v56, %v347_v58 }
  0x99   : > { %v248_v52 = vrot.slane %v247_v47, 4  ;;  %v349_v63 = vadd.f32 %v503_v59, %v348_v60 }
  0x9b   : > { %v249_v57 = vadd.f32 %v248_v52, %v247_v47  ;;  %v350_v0 = vadd.f32 %v504_v61, %v349_v63 }
  0x9d   : > { %v250_v62 = vrot.slane %v249_v57, 2  ;;  %v351_v2 = vrot.slane %v350_v0, 4 }
  0x9f   : > { %v251_v1 = vadd.f32 %v250_v62, %v249_v57  ;;  %v352_v3 = vadd.f32 %v351_v2, %v350_v0 }
  0xa1   : > { %v252_v4 = vrot.slane %v251_v1, 1  ;;  %v353_v5 = vrot.slane %v352_v3, 2 }
  0xa3   : > { %v354_v6 = vadd.f32 %v353_v5, %v352_v3  ;;  %v253_v7 = vadd.f32 %v252_v4, %v251_v1 }
  0xa5   : > { %v355_v8 = vrot.slane %v354_v6, 1 }
  0xa7   : > { %v356_v9 = vadd.f32 %v355_v8, %v354_v6 }
  0xa9   : > { %v357_v10 = vadd.f32 %v356_v9, %v253_v7 }
  0xab   : > { %358 = vst [vmem:[%s151_s25] sm:$0x1] %v357_v10 }
  0xac   : > { %618 = shalt.err (!%p615_p4)
}
  0xad   : > { %s619_s17 = scalar_lea.hbm %s926_s5, 16  ;;  %s623_s24 = scalar_lea.hbm %s976_s1, 32 }
  0xae   : > { %p620_p6 = scmp.ne.s32.totalorder %s926_s5, %s619_s17  ;;  %p624_p12 = scmp.lt.u32.totalorder %s926_s5, %s976_s1 }
  0xaf   : > { %p625_p1 = scmp.lt.u32.totalorder %s623_s24, %s619_s17  ;;  %p627_p8 = scmp.lt.u32.totalorder %s619_s17, %s926_s5 }
  0xb0   : > { %p621_p7 = pnand %p620_p6, %p984_p9 }
  0xb1   : > { %p626_p3 = por %p625_p1, %p624_p12 }
  0xb2   : > { %p622_p10 = pneg %p621_p7 }
  0xb3   : > { %p628_p11 = por %p627_p8, %p626_p3 }
  0xb5   : > { %p629_p0 = pnand %p628_p11, %p622_p10 }
  0xb7   : > { %632 = shalt.err (!%p629_p0)
}
  0xb8   : > { %513 = dma.vmem_to_hbm [thread:$0]  (%p984_p9), %s928_s28, 16, %s926_s5, %s360_s12  }
  0xb9 PF: > { %s385_s29 = sand.u32 1, %s667_s6   ;;  %p985_p5 = scmp.ne.s32.totalorder %s981_s21, 0 }
  0xba   : > { %p986_p13 = scmp.ge.s32.totalorder %s687_s11, 2  ;;  %s386_s3 = scalar_lea.sflag [#allocation4], %s385_s29 }
  0xbc   : > { %p520_p2 = pnand %p986_p13, %p985_p5 }
  0xbe   : > { %662 = dma.done.wait (!%p520_p2), %s386_s3, 16  }
  0xbf   : > { %664 = vsyncadd (!%p520_p2), %s386_s3, 4294967280  ;;  %s17_s11 = sadd.s32 1, %s687_s11   ;;  %s987_s6 = smov %s671_s7 }
  0xc0   : > { %p14_p4 = scmp.ge.s32.totalorder %s17_s11, 4   ;;  %s988_s7 = smov %s675_s8 }
  0xc1   : > { %s989_s8 = smov %s759_s20  ;;  %s990_s9 = smov %s683_s10 }
  0xc2   : > { %s991_s10 = smov %s993_s14  ;;  %16 = sbr.rel (!%p14_p4) target bundleno = 6 (0x6), region = 70 }
  0xc9   :  { %390 = vsyncpa [#allocation3], 1 }
  0xca   :  { %392 = vsyncpa [#allocation3 + $0x1], 1 }
  0xcb   :  { %393 = vsyncpa [#allocation4], 1 }
  0xcc   :  { %395 = vsyncpa [#allocation4 + $0x1], 1 }

</bundles_post_ra>
